<compile_context>
chip_gen: v6e
topology: v6e:2x2x1
jax: 0.10.0
libtpu: 0.0.40
codegen_flags: <defaults>
</compile_context>

<pallas_src>
import functools

import numpy as np

import jax
import jax.numpy as jnp
from jax.experimental import pallas as pl
from jax.experimental.pallas import tpu as pltpu


# ---------------------------------------------------------------------------
# Shared layout constants (host packing and kernel must agree)
# ---------------------------------------------------------------------------
def _round_up(v, m):
    return ((v + m - 1) // m) * m


def _layout(H, D, M, O):
    GP = _round_up(H, 128)               # per-gate lane slot
    CW = _round_up(H * (M + 1), 128)     # confidence + mode-head-L1 slot
    NW = 3 * GP + CW                     # slab-1 lane width (group B is the widest)
    NP = _round_up(M + M * O, 128)       # merged output lane width
    HK = H * (M + 1)                     # logical K of group E
    ROW_W0 = 4 * H                       # first wih0 row
    ROW_BIN0 = ROW_W0 + 3 * D            # layer-0 n-gate input bias
    ROW_BA = ROW_BIN0 + 1                # group-A bias row
    ROW_BB = ROW_BIN0 + 2                # group-B bias row
    ROW_BC = ROW_BIN0 + 3                # group-C bias row
    ROW_BD = ROW_BIN0 + 4                # group-D bias row
    R1 = ROW_BD + 1
    return dict(GP=GP, CW=CW, NW=NW, NP=NP, HK=HK, ROW_W0=ROW_W0,
                ROW_BIN0=ROW_BIN0, ROW_BA=ROW_BA, ROW_BB=ROW_BB,
                ROW_BC=ROW_BC, ROW_BD=ROW_BD, R1=R1)


# ---------------------------------------------------------------------------
# Kernel
# ---------------------------------------------------------------------------
def multimodal_gru_decoder_kernel(
    x_ref, h_ref, w_ref, w2_ref,
    out_ref, hout_ref,
    *, hidden_dim, input_dim, num_modes, output_dim,
):
    H, D, M = hidden_dim, input_dim, num_modes
    lay = _layout(H, D, M, output_dim)
    GP, CW, NP, HK = lay["GP"], lay["CW"], lay["NP"], lay["HK"]
    f32 = jnp.float32
    B = x_ref.shape[0]

    def mm(a, b):
        return jnp.dot(a, b, preferred_element_type=f32)

    def wrow(r, width):
        return w_ref[r:r + 1, 0:width]                  # [1, width], zero-padded

    x = x_ref[...].astype(f32)                          # [B, D]
    h0 = h_ref[0].astype(f32)                           # [B, H]
    h1 = h_ref[1].astype(f32)                           # [B, H]

    # ---- fused group matmuls depending only on kernel inputs ----
    # A: layer-0 hidden->gates (+ pre-summed r/z biases, n slot carries b_hn0)
    A = mm(h0, w_ref[0:H, 0:3 * GP]) + wrow(lay["ROW_BA"], 3 * GP)
    # C: layer-1 hidden->gates (+ hidden-side biases, n slot carries b_hn1)
    C = mm(h1, w_ref[2 * H:3 * H, 0:3 * GP]) + wrow(lay["ROW_BC"], 3 * GP)

    # ---- layer-0 input projection on the VPU (K = input_dim is tiny) ----
    # Hoist the lane broadcast of each x column and reuse for all three gates.
    xb = [jnp.broadcast_to(x[:, d:d + 1], (B, H)) for d in range(D)]

    def gi0(g):
        acc = xb[0] * wrow(lay["ROW_W0"] + g * D + 0, H)
        for d in range(1, D):
            acc = acc + xb[d] * wrow(lay["ROW_W0"] + g * D + d, H)
        return acc                                      # [B, H]

    # ---- GRU layer 0 ----
    r0 = jax.nn.sigmoid(gi0(0) + A[:, 0:H])
    z0 = jax.nn.sigmoid(gi0(1) + A[:, GP:GP + H])
    n0 = jnp.tanh(gi0(2) + wrow(lay["ROW_BIN0"], H) + r0 * A[:, 2 * GP:2 * GP + H])
    h0n = (1.0 - z0) * n0 + z0 * h0

    # ---- group B: everything with LHS h0n (layer-1 input gates | confidence L1 low) ----
    Bo = mm(h0n, w_ref[H:2 * H, 0:3 * GP + CW]) + wrow(lay["ROW_BB"], 3 * GP + CW)

    # ---- GRU layer 1 ----
    r1 = jax.nn.sigmoid(Bo[:, 0:H] + C[:, 0:H])
    z1 = jax.nn.sigmoid(Bo[:, GP:GP + H] + C[:, GP:GP + H])
    n1 = jnp.tanh(Bo[:, 2 * GP:2 * GP + H] + r1 * C[:, 2 * GP:2 * GP + H])
    h1n = (1.0 - z1) * n1 + z1 * h1

    hout_ref[0] = h0n.astype(hout_ref.dtype)
    hout_ref[1] = h1n.astype(hout_ref.dtype)

    # ---- group D: everything with LHS h1n (confidence L1 high | mode-head L1) ----
    Do = mm(h1n, w_ref[3 * H:4 * H, 0:CW]) + wrow(lay["ROW_BD"], CW)
    # lanes [0,H): confidence hidden; lanes [H, H+M*H): per-mode head hidden; rest 0.
    act = jnp.maximum(Bo[:, 3 * GP:3 * GP + CW] + Do, 0.0)   # [B, CW]

    # ---- group E: block-diagonal [confidence L2 | mode-head L2] ----
    Eo = mm(act[:, 0:HK], w2_ref[0:HK, :]) + w2_ref[HK:HK + 1, :]   # [B, NP]

    # ---- in-lane softmax over the first M lanes; remaining lanes keep predictions ----
    lane = jax.lax.broadcasted_iota(jnp.int32, (B, NP), 1)
    is_conf = lane < M
    mx = jnp.max(jnp.where(is_conf, Eo, -jnp.inf), axis=-1, keepdims=True)
    e = jnp.exp(Eo - mx)
    s = jnp.sum(jnp.where(is_conf, e, 0.0), axis=-1, keepdims=True)
    out_ref[...] = jnp.where(is_conf, e / s, Eo).astype(out_ref.dtype)


# ---------------------------------------------------------------------------
# Host-side packing of the PyTorch-style parameter tuple into 2 slabs
# ---------------------------------------------------------------------------
def pack_params(params, *, input_dim, hidden_dim, num_modes, output_dim):
    (wih0, whh0, bih0, bhh0, wih1, whh1, bih1, bhh1,
     mw1, mb1, mw2, mb2, cw1, cb1, cw2, cb2) = params
    H, D, M, O = hidden_dim, input_dim, num_modes, output_dim
    lay = _layout(H, D, M, O)
    GP, NP, HK = lay["GP"], lay["NP"], lay["HK"]

    f32 = np.float32
    npa = lambda a: np.asarray(a, dtype=f32)
    wih0, whh0, wih1, whh1 = map(npa, (wih0, whh0, wih1, whh1))
    bih0, bhh0, bih1, bhh1 = [npa(b).reshape(-1) for b in (bih0, bhh0, bih1, bhh1)]
    mw1, mb1, mw2, mb2 = map(npa, (mw1, mb1, mw2, mb2))
    cw1, cb1, cw2, cb2 = npa(cw1), npa(cb1).reshape(-1), npa(cw2), npa(cb2).reshape(-1)

    slab1 = np.zeros((lay["R1"], lay["NW"]), f32)

    # Group A rows [0,H): layer-0 hidden->gates (gate order r, z, n).
    for g in range(3):
        slab1[0:H, g * GP:g * GP + H] = whh0[:, g * H:(g + 1) * H]
    # Group B rows [H,2H): layer-1 input->gates + confidence L1 (h0n half).
    for g in range(3):
        slab1[H:2 * H, g * GP:g * GP + H] = wih1[:, g * H:(g + 1) * H]
    slab1[H:2 * H, 3 * GP:3 * GP + H] = cw1[0:H, :]
    # Group C rows [2H,3H): layer-1 hidden->gates.
    for g in range(3):
        slab1[2 * H:3 * H, g * GP:g * GP + H] = whh1[:, g * H:(g + 1) * H]
    # Group D rows [3H,4H): [confidence L1 (h1n half) | mode-head L1 concat].
    slab1[3 * H:4 * H, 0:H] = cw1[H:2 * H, :]
    for m in range(M):
        slab1[3 * H:4 * H, H + m * H:H + (m + 1) * H] = mw1[m]

    # Layer-0 input weights (one row per gate per input feature).
    for g in range(3):
        for d in range(D):
            slab1[lay["ROW_W0"] + g * D + d, 0:H] = wih0[d, g * H:(g + 1) * H]
    # Biases.
    slab1[lay["ROW_BIN0"], 0:H] = bih0[2 * H:3 * H]                       # b_in0
    for g, b in enumerate([bih0[0:H] + bhh0[0:H],
                           bih0[H:2 * H] + bhh0[H:2 * H],
                           bhh0[2 * H:3 * H]]):
        slab1[lay["ROW_BA"], g * GP:g * GP + H] = b
    for g in range(3):
        slab1[lay["ROW_BB"], g * GP:g * GP + H] = bih1[g * H:(g + 1) * H]
    slab1[lay["ROW_BB"], 3 * GP:3 * GP + H] = cb1
    for g in range(3):
        slab1[lay["ROW_BC"], g * GP:g * GP + H] = bhh1[g * H:(g + 1) * H]
    for m in range(M):
        slab1[lay["ROW_BD"], H + m * H:H + (m + 1) * H] = mb1[m].reshape(-1)

    # Slab 2: block-diagonal [confidence L2 | mode-head L2] plus its bias row.
    slab2 = np.zeros((HK + 1, NP), f32)
    slab2[0:H, 0:M] = cw2
    for m in range(M):
        slab2[H + m * H:H + (m + 1) * H, M + m * O:M + (m + 1) * O] = mw2[m]
    slab2[HK, 0:M] = cb2
    for m in range(M):
        slab2[HK, M + m * O:M + (m + 1) * O] = mb2[m].reshape(-1)

    return jnp.asarray(slab1), jnp.asarray(slab2)


# ---------------------------------------------------------------------------
# Wrapper
# ---------------------------------------------------------------------------
def multimodal_gru_decoder(x, hidden, packed, *, input_dim, hidden_dim,
                           num_modes, output_dim):
    """Mirrors MultiModalGRUDecoder.forward for x of shape [B,1,D] or [B,D].

    WARNING: `hidden` is donated (aliased to the hidden-state output); do not reuse
    the original `hidden` array after this call.
    """
    if x.ndim == 3 and x.shape[1] == 1:
        x2d = x[:, 0, :]
    elif x.ndim == 2:
        x2d = x
    else:
        raise ValueError(f"unsupported x shape {x.shape}")
    B = x2d.shape[0]
    L = hidden.shape[0]
    assert L == 2, "kernel is specialized for num_layers=2 (module default)"

    H, D, M, O = hidden_dim, input_dim, num_modes, output_dim
    lay = _layout(H, D, M, O)
    GP, CW, NP, HK = lay["GP"], lay["CW"], lay["NP"], lay["HK"]
    slab1, slab2 = packed

    kernel = functools.partial(
        multimodal_gru_decoder_kernel,
        hidden_dim=H, input_dim=D, num_modes=M, output_dim=O)

    vmem = pl.BlockSpec(memory_space=pltpu.MemorySpace.VMEM)

    flops = int(2 * 2 * B * H * (3 * GP)        # groups A and C
                + 2 * B * H * (3 * GP + CW)     # group B
                + 2 * B * H * CW                # group D
                + 2 * B * HK * NP               # group E
                + 2 * B * D * 3 * H)            # layer-0 input projection (VPU)
    transcendentals = int(B * (6 * H + NP))
    bytes_accessed = int(
        sum(int(a.size) * a.dtype.itemsize for a in (x2d, hidden, slab1, slab2))
        + (B * NP + L * B * H) * 4)

    out, hout = pl.pallas_call(
        kernel,
        out_shape=(
            jax.ShapeDtypeStruct((B, NP), jnp.float32),      # [conf probs | predictions]
            jax.ShapeDtypeStruct((L, B, H), jnp.float32),    # hidden_state (aliased)
        ),
        in_specs=[vmem] * 4,
        out_specs=(vmem, vmem),
        input_output_aliases={1: 1},
        cost_estimate=pl.CostEstimate(flops=flops,
                                      transcendentals=transcendentals,
                                      bytes_accessed=bytes_accessed),
    )(x2d, hidden, slab1, slab2)

    conf = out[:, 0:M]
    pred = out[:, M:M + M * O].reshape(B, M, O)[:, None, :, :]   # [B, 1, M, O]
    return pred, conf, hout


# ---------------------------------------------------------------------------
# Pure-JAX reference (for correctness check), on the raw PyTorch-style params
# ---------------------------------------------------------------------------
def reference_forward(x, hidden, params, *, hidden_dim, num_modes):
    (wih0, whh0, bih0, bhh0, wih1, whh1, bih1, bhh1,
     mw1, mb1, mw2, mb2, cw1, cb1, cw2, cb2) = params
    H = hidden_dim
    x2d = x[:, 0, :]
    h0, h1 = hidden[0], hidden[1]

    def cell(inp, h, wih, whh, bih, bhh):
        gi = inp @ wih + bih
        gh = h @ whh + bhh
        r = jax.nn.sigmoid(gi[:, 0:H] + gh[:, 0:H])
        z = jax.nn.sigmoid(gi[:, H:2 * H] + gh[:, H:2 * H])
        n = jnp.tanh(gi[:, 2 * H:3 * H] + r * gh[:, 2 * H:3 * H])
        return (1.0 - z) * n + z * h

    h0n = cell(x2d, h0, wih0, whh0, bih0, bhh0)
    h1n = cell(h0n, h1, wih1, whh1, bih1, bhh1)
    output = h1n

    preds = []
    for m in range(num_modes):
        hm = jnp.maximum(output @ mw1[m] + mb1[m], 0.0)
        preds.append(hm @ mw2[m] + mb2[m])
    pred = jnp.stack(preds, axis=1)[:, None, :, :]

    hcat = jnp.concatenate([h0n, h1n], axis=1)
    c1 = jnp.maximum(hcat @ cw1 + cb1, 0.0)
    logits = c1 @ cw2 + cb2
    probs = jax.nn.softmax(logits, axis=-1)
    return pred, probs, jnp.stack([h0n, h1n], axis=0)


if __name__ == "__main__":
    # Small, module-consistent shapes.
    B = 4
    INPUT_DIM = 2
    HIDDEN_DIM = 32
    OUTPUT_DIM = 2
    NUM_LAYERS = 2
    NUM_MODES = 3

    key = jax.random.PRNGKey(0)
    keys = jax.random.split(key, 20)
    k = 1.0 / jnp.sqrt(HIDDEN_DIM)

    def uni(kk, shape, scale=k):
        return jax.random.uniform(kk, shape, jnp.float32, -scale, scale)

    # GRU weights (stored transposed: [in, 3H]); gate order (r, z, n) as in PyTorch.
    wih0 = uni(keys[0], (INPUT_DIM, 3 * HIDDEN_DIM))
    whh0 = uni(keys[1], (HIDDEN_DIM, 3 * HIDDEN_DIM))
    bih0 = uni(keys[2], (1, 3 * HIDDEN_DIM))
    bhh0 = uni(keys[3], (1, 3 * HIDDEN_DIM))
    wih1 = uni(keys[4], (HIDDEN_DIM, 3 * HIDDEN_DIM))
    whh1 = uni(keys[5], (HIDDEN_DIM, 3 * HIDDEN_DIM))
    bih1 = uni(keys[6], (1, 3 * HIDDEN_DIM))
    bhh1 = uni(keys[7], (1, 3 * HIDDEN_DIM))

    # Mode projection heads, stacked over modes.
    mw1 = uni(keys[8], (NUM_MODES, HIDDEN_DIM, HIDDEN_DIM))
    mb1 = uni(keys[9], (NUM_MODES, 1, HIDDEN_DIM))
    mw2 = uni(keys[10], (NUM_MODES, HIDDEN_DIM, OUTPUT_DIM))
    mb2 = uni(keys[11], (NUM_MODES, 1, OUTPUT_DIM))

    # Confidence scorer: Linear(L*H, H) -> ReLU -> Linear(H, M)
    cw1 = uni(keys[12], (NUM_LAYERS * HIDDEN_DIM, HIDDEN_DIM),
              scale=1.0 / jnp.sqrt(NUM_LAYERS * HIDDEN_DIM))
    cb1 = uni(keys[13], (1, HIDDEN_DIM),
              scale=1.0 / jnp.sqrt(NUM_LAYERS * HIDDEN_DIM))
    cw2 = uni(keys[14], (HIDDEN_DIM, NUM_MODES))
    cb2 = uni(keys[15], (1, NUM_MODES))

    params = (wih0, whh0, bih0, bhh0, wih1, whh1, bih1, bhh1,
              mw1, mb1, mw2, mb2, cw1, cb1, cw2, cb2)

    # Inputs: x [B, 1, input_dim], hidden [num_layers, B, hidden_dim]
    x = jax.random.normal(keys[16], (B, 1, INPUT_DIM), jnp.float32)
    hidden = jax.random.normal(keys[17], (NUM_LAYERS, B, HIDDEN_DIM), jnp.float32)

    # Reference computed first (kernel donates `hidden` into its hidden-state output).
    pred_r, conf_r, hout_r = reference_forward(
        x, hidden, params, hidden_dim=HIDDEN_DIM, num_modes=NUM_MODES)
    jax.block_until_ready((pred_r, conf_r, hout_r))

    packed = pack_params(params, input_dim=INPUT_DIM, hidden_dim=HIDDEN_DIM,
                         num_modes=NUM_MODES, output_dim=OUTPUT_DIM)

    pred, conf, hout = multimodal_gru_decoder(
        x, hidden, packed,
        input_dim=INPUT_DIM, hidden_dim=HIDDEN_DIM,
        num_modes=NUM_MODES, output_dim=OUTPUT_DIM)
    jax.block_until_ready((pred, conf, hout))

    assert pred.shape == (B, 1, NUM_MODES, OUTPUT_DIM)
    assert conf.shape == (B, NUM_MODES)
    assert hout.shape == (NUM_LAYERS, B, HIDDEN_DIM)
    assert jnp.allclose(pred, pred_r, atol=1e-5, rtol=1e-5)
    assert jnp.allclose(conf, conf_r, atol=1e-5, rtol=1e-5)
    assert jnp.allclose(hout, hout_r, atol=1e-5, rtol=1e-5)

    print("KERNEL_OK")
</pallas_src>

<mosaic_0001>
module attributes {stable_mosaic.version = 11 : i64} {
  func.func @multimodal_gru_decoder_kernel(%arg0: memref<4x2xf32, #tpu.memory_space<vmem>>, %arg1: memref<2x4x32xf32, #tpu.memory_space<vmem>>, %arg2: memref<139x512xf32, #tpu.memory_space<vmem>>, %arg3: memref<129x128xf32, #tpu.memory_space<vmem>>, %arg4: memref<4x128xf32, #tpu.memory_space<vmem>>, %arg5: memref<2x4x32xf32, #tpu.memory_space<vmem>>) attributes {dimension_semantics = [], scalar_prefetch = 0 : i64, scratch_operands = 0 : i64, tpu.core_type = #tpu.core_type<tc>} {
    %c0 = arith.constant 0 : index
    %c0_0 = arith.constant 0 : index
    %0 = vector.load %arg0[%c0, %c0_0] : memref<4x2xf32, #tpu.memory_space<vmem>>, vector<4x2xf32>
    %c0_1 = arith.constant 0 : index
    %c0_2 = arith.constant 0 : index
    %c0_3 = arith.constant 0 : index
    %1 = vector.load %arg1[%c0_1, %c0_2, %c0_3] : memref<2x4x32xf32, #tpu.memory_space<vmem>>, vector<1x4x32xf32>
    %2 = vector.shape_cast %1 : vector<1x4x32xf32> to vector<4x32xf32>
    %c1 = arith.constant 1 : index
    %c0_4 = arith.constant 0 : index
    %c0_5 = arith.constant 0 : index
    %3 = vector.load %arg1[%c1, %c0_4, %c0_5] : memref<2x4x32xf32, #tpu.memory_space<vmem>>, vector<1x4x32xf32>
    %4 = vector.shape_cast %3 : vector<1x4x32xf32> to vector<4x32xf32>
    %c0_6 = arith.constant 0 : index
    %c0_7 = arith.constant 0 : index
    %5 = vector.load %arg2[%c0_6, %c0_7] : memref<139x512xf32, #tpu.memory_space<vmem>>, vector<32x384xf32>
    %cst = arith.constant dense<0.000000e+00> : vector<4x384xf32>
    %6 = tpu.matmul %2, %5, %cst {dimension_numbers = #tpu.dot_dimension_numbers<[1], [0], [0], [1], [0, 0, 1, 1], [], []>} : vector<4x32xf32>, vector<32x384xf32>, vector<4x384xf32> -> vector<4x384xf32>
    %c135 = arith.constant 135 : index
    %c0_8 = arith.constant 0 : index
    %7 = vector.load %arg2[%c135, %c0_8] : memref<139x512xf32, #tpu.memory_space<vmem>>, vector<1x384xf32>
    %8 = vector.broadcast %7 : vector<1x384xf32> to vector<4x384xf32>
    %9 = arith.addf %6, %8 : vector<4x384xf32>
    %c64 = arith.constant 64 : index
    %c0_9 = arith.constant 0 : index
    %10 = vector.load %arg2[%c64, %c0_9] : memref<139x512xf32, #tpu.memory_space<vmem>>, vector<32x384xf32>
    %cst_10 = arith.constant dense<0.000000e+00> : vector<4x384xf32>
    %11 = tpu.matmul %4, %10, %cst_10 {dimension_numbers = #tpu.dot_dimension_numbers<[1], [0], [0], [1], [0, 0, 1, 1], [], []>} : vector<4x32xf32>, vector<32x384xf32>, vector<4x384xf32> -> vector<4x384xf32>
    %c137 = arith.constant 137 : index
    %c0_11 = arith.constant 0 : index
    %12 = vector.load %arg2[%c137, %c0_11] : memref<139x512xf32, #tpu.memory_space<vmem>>, vector<1x384xf32>
    %13 = vector.broadcast %12 : vector<1x384xf32> to vector<4x384xf32>
    %14 = arith.addf %11, %13 : vector<4x384xf32>
    %15 = vector.extract_strided_slice %0 {offsets = [0, 0], sizes = [4, 1], strides = [1, 1]} : vector<4x2xf32> to vector<4x1xf32>
    %16 = vector.shape_cast %15 : vector<4x1xf32> to vector<4x1xf32>
    %17 = vector.broadcast %16 : vector<4x1xf32> to vector<4x32xf32>
    %18 = vector.extract_strided_slice %0 {offsets = [0, 1], sizes = [4, 1], strides = [1, 1]} : vector<4x2xf32> to vector<4x1xf32>
    %19 = vector.shape_cast %18 : vector<4x1xf32> to vector<4x1xf32>
    %20 = vector.broadcast %19 : vector<4x1xf32> to vector<4x32xf32>
    %c128 = arith.constant 128 : index
    %c0_12 = arith.constant 0 : index
    %21 = vector.load %arg2[%c128, %c0_12] : memref<139x512xf32, #tpu.memory_space<vmem>>, vector<1x32xf32>
    %22 = vector.broadcast %21 : vector<1x32xf32> to vector<4x32xf32>
    %23 = arith.mulf %17, %22 : vector<4x32xf32>
    %c129 = arith.constant 129 : index
    %c0_13 = arith.constant 0 : index
    %24 = vector.load %arg2[%c129, %c0_13] : memref<139x512xf32, #tpu.memory_space<vmem>>, vector<1x32xf32>
    %25 = vector.broadcast %24 : vector<1x32xf32> to vector<4x32xf32>
    %26 = arith.mulf %20, %25 : vector<4x32xf32>
    %27 = arith.addf %23, %26 : vector<4x32xf32>
    %28 = vector.extract_strided_slice %9 {offsets = [0, 0], sizes = [4, 32], strides = [1, 1]} : vector<4x384xf32> to vector<4x32xf32>
    %29 = arith.addf %27, %28 : vector<4x32xf32>
    %30 = arith.negf %29 : vector<4x32xf32>
    %31 = math.exp %30 : vector<4x32xf32>
    %cst_14 = arith.constant 1.000000e+00 : f32
    %32 = vector.broadcast %cst_14 : f32 to vector<4x32xf32>
    %33 = arith.addf %32, %31 : vector<4x32xf32>
    %34 = arith.divf %32, %33 : vector<4x32xf32>
    %c130 = arith.constant 130 : index
    %c0_15 = arith.constant 0 : index
    %35 = vector.load %arg2[%c130, %c0_15] : memref<139x512xf32, #tpu.memory_space<vmem>>, vector<1x32xf32>
    %36 = vector.broadcast %35 : vector<1x32xf32> to vector<4x32xf32>
    %37 = arith.mulf %17, %36 : vector<4x32xf32>
    %c131 = arith.constant 131 : index
    %c0_16 = arith.constant 0 : index
    %38 = vector.load %arg2[%c131, %c0_16] : memref<139x512xf32, #tpu.memory_space<vmem>>, vector<1x32xf32>
    %39 = vector.broadcast %38 : vector<1x32xf32> to vector<4x32xf32>
    %40 = arith.mulf %20, %39 : vector<4x32xf32>
    %41 = arith.addf %37, %40 : vector<4x32xf32>
    %42 = vector.extract_strided_slice %9 {offsets = [0, 128], sizes = [4, 32], strides = [1, 1]} : vector<4x384xf32> to vector<4x32xf32>
    %43 = arith.addf %41, %42 : vector<4x32xf32>
    %44 = arith.negf %43 : vector<4x32xf32>
    %45 = math.exp %44 : vector<4x32xf32>
    %cst_17 = arith.constant 1.000000e+00 : f32
    %46 = vector.broadcast %cst_17 : f32 to vector<4x32xf32>
    %47 = arith.addf %46, %45 : vector<4x32xf32>
    %48 = arith.divf %46, %47 : vector<4x32xf32>
    %c132 = arith.constant 132 : index
    %c0_18 = arith.constant 0 : index
    %49 = vector.load %arg2[%c132, %c0_18] : memref<139x512xf32, #tpu.memory_space<vmem>>, vector<1x32xf32>
    %50 = vector.broadcast %49 : vector<1x32xf32> to vector<4x32xf32>
    %51 = arith.mulf %17, %50 : vector<4x32xf32>
    %c133 = arith.constant 133 : index
    %c0_19 = arith.constant 0 : index
    %52 = vector.load %arg2[%c133, %c0_19] : memref<139x512xf32, #tpu.memory_space<vmem>>, vector<1x32xf32>
    %53 = vector.broadcast %52 : vector<1x32xf32> to vector<4x32xf32>
    %54 = arith.mulf %20, %53 : vector<4x32xf32>
    %55 = arith.addf %51, %54 : vector<4x32xf32>
    %c134 = arith.constant 134 : index
    %c0_20 = arith.constant 0 : index
    %56 = vector.load %arg2[%c134, %c0_20] : memref<139x512xf32, #tpu.memory_space<vmem>>, vector<1x32xf32>
    %57 = vector.broadcast %56 : vector<1x32xf32> to vector<4x32xf32>
    %58 = arith.addf %55, %57 : vector<4x32xf32>
    %59 = vector.extract_strided_slice %9 {offsets = [0, 256], sizes = [4, 32], strides = [1, 1]} : vector<4x384xf32> to vector<4x32xf32>
    %60 = arith.mulf %34, %59 : vector<4x32xf32>
    %61 = arith.addf %58, %60 : vector<4x32xf32>
    %62 = math.tanh %61 : vector<4x32xf32>
    %cst_21 = arith.constant 1.000000e+00 : f32
    %63 = vector.broadcast %cst_21 : f32 to vector<4x32xf32>
    %64 = arith.subf %63, %48 : vector<4x32xf32>
    %65 = arith.mulf %64, %62 : vector<4x32xf32>
    %66 = arith.mulf %48, %2 : vector<4x32xf32>
    %67 = arith.addf %65, %66 : vector<4x32xf32>
    %c32 = arith.constant 32 : index
    %c0_22 = arith.constant 0 : index
    %68 = vector.load %arg2[%c32, %c0_22] : memref<139x512xf32, #tpu.memory_space<vmem>>, vector<32x512xf32>
    %cst_23 = arith.constant dense<0.000000e+00> : vector<4x512xf32>
    %69 = tpu.matmul %67, %68, %cst_23 {dimension_numbers = #tpu.dot_dimension_numbers<[1], [0], [0], [1], [0, 0, 1, 1], [], []>} : vector<4x32xf32>, vector<32x512xf32>, vector<4x512xf32> -> vector<4x512xf32>
    %c136 = arith.constant 136 : index
    %c0_24 = arith.constant 0 : index
    %70 = vector.load %arg2[%c136, %c0_24] : memref<139x512xf32, #tpu.memory_space<vmem>>, vector<1x512xf32>
    %71 = vector.broadcast %70 : vector<1x512xf32> to vector<4x512xf32>
    %72 = arith.addf %69, %71 : vector<4x512xf32>
    %73 = vector.extract_strided_slice %72 {offsets = [0, 0], sizes = [4, 32], strides = [1, 1]} : vector<4x512xf32> to vector<4x32xf32>
    %74 = vector.extract_strided_slice %14 {offsets = [0, 0], sizes = [4, 32], strides = [1, 1]} : vector<4x384xf32> to vector<4x32xf32>
    %75 = arith.addf %73, %74 : vector<4x32xf32>
    %76 = arith.negf %75 : vector<4x32xf32>
    %77 = math.exp %76 : vector<4x32xf32>
    %cst_25 = arith.constant 1.000000e+00 : f32
    %78 = vector.broadcast %cst_25 : f32 to vector<4x32xf32>
    %79 = arith.addf %78, %77 : vector<4x32xf32>
    %80 = arith.divf %78, %79 : vector<4x32xf32>
    %81 = vector.extract_strided_slice %72 {offsets = [0, 128], sizes = [4, 32], strides = [1, 1]} : vector<4x512xf32> to vector<4x32xf32>
    %82 = vector.extract_strided_slice %14 {offsets = [0, 128], sizes = [4, 32], strides = [1, 1]} : vector<4x384xf32> to vector<4x32xf32>
    %83 = arith.addf %81, %82 : vector<4x32xf32>
    %84 = arith.negf %83 : vector<4x32xf32>
    %85 = math.exp %84 : vector<4x32xf32>
    %cst_26 = arith.constant 1.000000e+00 : f32
    %86 = vector.broadcast %cst_26 : f32 to vector<4x32xf32>
    %87 = arith.addf %86, %85 : vector<4x32xf32>
    %88 = arith.divf %86, %87 : vector<4x32xf32>
    %89 = vector.extract_strided_slice %72 {offsets = [0, 256], sizes = [4, 32], strides = [1, 1]} : vector<4x512xf32> to vector<4x32xf32>
    %90 = vector.extract_strided_slice %14 {offsets = [0, 256], sizes = [4, 32], strides = [1, 1]} : vector<4x384xf32> to vector<4x32xf32>
    %91 = arith.mulf %80, %90 : vector<4x32xf32>
    %92 = arith.addf %89, %91 : vector<4x32xf32>
    %93 = math.tanh %92 : vector<4x32xf32>
    %cst_27 = arith.constant 1.000000e+00 : f32
    %94 = vector.broadcast %cst_27 : f32 to vector<4x32xf32>
    %95 = arith.subf %94, %88 : vector<4x32xf32>
    %96 = arith.mulf %95, %93 : vector<4x32xf32>
    %97 = arith.mulf %88, %4 : vector<4x32xf32>
    %98 = arith.addf %96, %97 : vector<4x32xf32>
    %c0_28 = arith.constant 0 : index
    %c0_29 = arith.constant 0 : index
    %c0_30 = arith.constant 0 : index
    %99 = vector.load %arg5[%c0_28, %c0_29, %c0_30] : memref<2x4x32xf32, #tpu.memory_space<vmem>>, vector<1x4x32xf32>
    %100 = vector.shape_cast %99 : vector<1x4x32xf32> to vector<4x32xf32>
    %101 = vector.shape_cast %67 : vector<4x32xf32> to vector<1x4x32xf32>
    tpu.vector_store %arg5[%c0_28, %c0_29, %c0_30], %101 {strides = array<i32>} : memref<2x4x32xf32, #tpu.memory_space<vmem>>, vector<1x4x32xf32>,
    %c1_31 = arith.constant 1 : index
    %c0_32 = arith.constant 0 : index
    %c0_33 = arith.constant 0 : index
    %102 = vector.load %arg5[%c1_31, %c0_32, %c0_33] : memref<2x4x32xf32, #tpu.memory_space<vmem>>, vector<1x4x32xf32>
    %103 = vector.shape_cast %102 : vector<1x4x32xf32> to vector<4x32xf32>
    %104 = vector.shape_cast %98 : vector<4x32xf32> to vector<1x4x32xf32>
    tpu.vector_store %arg5[%c1_31, %c0_32, %c0_33], %104 {strides = array<i32>} : memref<2x4x32xf32, #tpu.memory_space<vmem>>, vector<1x4x32xf32>,
    %c96 = arith.constant 96 : index
    %c0_34 = arith.constant 0 : index
    %105 = vector.load %arg2[%c96, %c0_34] : memref<139x512xf32, #tpu.memory_space<vmem>>, vector<32x128xf32>
    %cst_35 = arith.constant dense<0.000000e+00> : vector<4x128xf32>
    %106 = tpu.matmul %98, %105, %cst_35 {dimension_numbers = #tpu.dot_dimension_numbers<[1], [0], [0], [1], [0, 0, 1, 1], [], []>} : vector<4x32xf32>, vector<32x128xf32>, vector<4x128xf32> -> vector<4x128xf32>
    %c138 = arith.constant 138 : index
    %c0_36 = arith.constant 0 : index
    %107 = vector.load %arg2[%c138, %c0_36] : memref<139x512xf32, #tpu.memory_space<vmem>>, vector<1x128xf32>
    %108 = vector.broadcast %107 : vector<1x128xf32> to vector<4x128xf32>
    %109 = arith.addf %106, %108 : vector<4x128xf32>
    %110 = vector.extract_strided_slice %72 {offsets = [0, 384], sizes = [4, 128], strides = [1, 1]} : vector<4x512xf32> to vector<4x128xf32>
    %111 = arith.addf %110, %109 : vector<4x128xf32>
    %cst_37 = arith.constant 0.000000e+00 : f32
    %112 = vector.broadcast %cst_37 : f32 to vector<4x128xf32>
    %113 = arith.maximumf %111, %112 : vector<4x128xf32>
    %c0_38 = arith.constant 0 : index
    %c0_39 = arith.constant 0 : index
    %114 = vector.load %arg3[%c0_38, %c0_39] : memref<129x128xf32, #tpu.memory_space<vmem>>, vector<128x128xf32>
    %cst_40 = arith.constant dense<0.000000e+00> : vector<4x128xf32>
    %115 = tpu.matmul %113, %114, %cst_40 {dimension_numbers = #tpu.dot_dimension_numbers<[1], [0], [0], [1], [0, 0, 1, 1], [], []>} : vector<4x128xf32>, vector<128x128xf32>, vector<4x128xf32> -> vector<4x128xf32>
    %c128_41 = arith.constant 128 : index
    %c0_42 = arith.constant 0 : index
    %116 = vector.load %arg3[%c128_41, %c0_42] : memref<129x128xf32, #tpu.memory_space<vmem>>, vector<1x128xf32>
    %117 = vector.broadcast %116 : vector<1x128xf32> to vector<4x128xf32>
    %118 = arith.addf %115, %117 : vector<4x128xf32>
    %119 = tpu.iota {dimensions = array<i32: 1>} : vector<4x128xi32>
    %c3_i32 = arith.constant 3 : i32
    %120 = vector.broadcast %c3_i32 : i32 to vector<4x128xi32>
    %121 = arith.cmpi slt, %119, %120 : vector<4x128xi32>
    %cst_43 = arith.constant 0xFF800000 : f32
    %122 = vector.broadcast %cst_43 : f32 to vector<4x128xf32>
    %123 = arith.select %121, %118, %122 : vector<4x128xi1>, vector<4x128xf32>
    %cst_44 = arith.constant dense<0xFF800000> : vector<4xf32>
    %124 = vector.multi_reduction <maximumf>, %123, %cst_44 [1] : vector<4x128xf32> to vector<4xf32>
    %125 = vector.shape_cast %124 : vector<4xf32> to vector<4x1xf32>
    %126 = vector.broadcast %125 : vector<4x1xf32> to vector<4x128xf32>
    %127 = arith.subf %118, %126 : vector<4x128xf32>
    %128 = math.exp %127 : vector<4x128xf32>
    %cst_45 = arith.constant 0.000000e+00 : f32
    %129 = vector.broadcast %cst_45 : f32 to vector<4x128xf32>
    %130 = arith.select %121, %128, %129 : vector<4x128xi1>, vector<4x128xf32>
    %cst_46 = arith.constant dense<0.000000e+00> : vector<4xf32>
    %131 = vector.multi_reduction <add>, %130, %cst_46 [1] : vector<4x128xf32> to vector<4xf32>
    %132 = vector.shape_cast %131 : vector<4xf32> to vector<4x1xf32>
    %133 = vector.broadcast %132 : vector<4x1xf32> to vector<4x128xf32>
    %134 = arith.divf %128, %133 : vector<4x128xf32>
    %135 = arith.select %121, %134, %118 : vector<4x128xi1>, vector<4x128xf32>
    %c0_47 = arith.constant 0 : index
    %c0_48 = arith.constant 0 : index
    %136 = vector.load %arg4[%c0_47, %c0_48] : memref<4x128xf32, #tpu.memory_space<vmem>>, vector<4x128xf32>
    tpu.vector_store %arg4[%c0_47, %c0_48], %135 {strides = array<i32>} : memref<4x128xf32, #tpu.memory_space<vmem>>, vector<4x128xf32>,
    return
  }
}

</mosaic_0001>

<bundles_post_ra>
// kernel: tpu_custom_call.1
= control target key start
LH: loop header
LB: loop body
LE: loop exit
PB: predicated region body
PF: predicated region fallthrough
CT: control target
= control target key end

     0   :  { %11 = vsyncpa [#allocation3], 0  ;;  %s1311_s0 = inlined_call_operand.vmem [shape: f32[4,2], index: 0, kind: input, shape index: {}]   ;;  %s1312_s1 = inlined_call_operand.hbm [shape: f32[2,4,32], index: 1, kind: input, shape index: {}, may-alias: {1,5}]   ;;  %s1313_s2 = inlined_call_operand.hbm [shape: f32[139,512], index: 2, kind: input, shape index: {}]   ;;  %s1314_s3 = inlined_call_operand.hbm [shape: f32[129,128], index: 3, kind: input, shape index: {}]   ;;  %s1315_s4 = inlined_call_operand.hbm [shape: f32[4,128], index: 4, kind: output, shape index: {0}]   ;;  %s1316_s5 = inlined_call_operand.hbm [shape: f32[2,4,32], index: 5, kind: output, shape index: {1}, may-alias: {1,5}]  }
   0x1   :  { %12 = vsyncpa [#allocation6], 0 }
   0x2   :  { %13 = vsyncpa [#allocation4], 0 }
   0x3   :  { %14 = vsyncpa [#allocation10], 0  ;;  %s1154_s18 = smov [#allocation5]  }
   0x4   :  { %s34_s19 = sshll.u32 %s1154_s18, 4  ;;  %s35_s19 = int_to_ptr.vmem [resolvable:$true] %s34_s19 }
   0x5   :  { %s1054_s20 = scalar_lea.vmem %s35_s19, 9216  ;;  %p1059_p1 = scmp.lt.s32.totalorder %s35_s19, %s35_s19 }
   0x6   :  { %p1055_p0 = scmp.ne.s32.totalorder %s35_s19, %s1054_s20  ;;  %p1060_p2 = scmp.lt.s32.totalorder %s1054_s20, %s1054_s20 }
   0x8   :  { %p1061_p3 = por %p1060_p2, %p1059_p1 }
   0xa   :  { %p1062_p4 = pnand %p1061_p3, %p1055_p0 }
   0xc   :  { %1065 = shalt.err (!%p1062_p4)
}
   0xd   :  { %s1155_s21 = smov 512   ;;  %s1156_s22 = smov 32  }
   0xe   :  { %40 = dma.hbm_to_vmem [thread:$0]  %s1313_s2, 9216, %s35_s19, [#allocation6], %s1155_s21, %s1155_s21, %s1156_s22  }
   0xf   :  { %s1157_s25 = smov [#allocation2]  }
  0x10   :  { %s22_s26 = sshll.u32 %s1157_s25, 4  ;;  %s23_s26 = int_to_ptr.vmem [resolvable:$true] %s22_s26 }
  0x11   :  { %s1074_s27 = scalar_lea.vmem %s23_s26, 128  ;;  %p1079_p6 = scmp.lt.s32.totalorder %s23_s26, %s23_s26 }
  0x12   :  { %p1075_p5 = scmp.ne.s32.totalorder %s23_s26, %s1074_s27  ;;  %p1080_p7 = scmp.lt.s32.totalorder %s1074_s27, %s1074_s27 }
  0x14   :  { %p1081_p8 = por %p1080_p7, %p1079_p6 }
  0x16   :  { %p1082_p9 = pnand %p1081_p8, %p1075_p5 }
  0x18   :  { %1085 = shalt.err (!%p1082_p9)
}
  0x19   :  { %s1158_s28 = smov 64   ;;  %s1159_s29 = smov 4  }
  0x1a   :  { %28 = dma.hbm_to_vmem [thread:$0]  %s1312_s1, 128, %s23_s26, [#allocation3], %s1158_s28, %s1158_s28, %s1159_s29  }
  0x1b   :  { %s1160_s2 = smov [#allocation7]  }
  0x1c   :  { %s46_s7 = sshll.u32 %s1160_s2, 4  ;;  %s47_s7 = int_to_ptr.vmem [resolvable:$true] %s46_s7 }
  0x1d   :  { %s1094_s8 = scalar_lea.vmem %s47_s7, 2176  ;;  %p1099_p11 = scmp.lt.s32.totalorder %s47_s7, %s47_s7 }
  0x1e   :  { %p1095_p10 = scmp.ne.s32.totalorder %s47_s7, %s1094_s8  ;;  %p1100_p12 = scmp.lt.s32.totalorder %s1094_s8, %s1094_s8 }
  0x20   :  { %p1101_p13 = por %p1100_p12, %p1099_p11 }
  0x22   :  { %p1102_p0 = pnand %p1101_p13, %p1095_p10 }
  0x24   :  { %1105 = shalt.err (!%p1102_p0)
}
  0x25   :  { %s1161_s9 = smov 128   ;;  %s1162_s10 = smov 8  }
  0x26   :  { %52 = dma.hbm_to_vmem [thread:$0]  %s1314_s3, 2176, %s47_s7, [#allocation6], %s1161_s9, %s1161_s9, %s1162_s10  }
  0x27   :  { %1146 = dma.done.wait [#allocation3], 128  }
  0x28   :  { %1147 = vsyncadd [#allocation3], 4294967168 }
  0x29   :  { %1148 = dma.done.wait [#allocation6], 11392  }
  0x2a   :  { %1149 = vsyncadd [#allocation6], 4294955904  ;;  %v1163_v0 = vmov 0.0   ;;  %v1164_v1 = vmov 0   ;;  %vm1165_vm0 = vmmov 0   ;;  %v76_v2 = vld [vmem:[#allocation5 + $0x68] sm:$0xff]  ;;  %v81_v46 = vlaneseq }
  0x2b   :  { %164 = vmatprep.mubr.f32.mxu0 %v1163_v0  ;;  %1020 = vset.pattern.permute.xlu0 %v1164_v1  ;;  %v75_v3 = vld [vmem:[#allocation5 + $0x60] sm:$0xff]  ;;  %v73_v4 = vld [vmem:[#allocation5 + $0x48] sm:$0xff]  ;;  %v62_v9 = vld [vmem:[%s1311_s0] sm:$0xf]  ;;  %vm96_vm1 = vcmask 261120   ;;  %v1166_v15 = vmov 1  }
  0x2c   :  { %948 = vmatprep.subr.mxu1 %v1163_v0  ;;  %956 = vmatprep.mubr.msk.f32.mxu1 %vm1165_vm0, %v1163_v0  ;;  %v72_v5 = vld [vmem:[#allocation5 + $0x40] sm:$0xff]  ;;  %v70_v6 = vld [vmem:[#allocation5 + $0x28] sm:$0xff]  ;;  %v1218_v11 = vld [vmem:[#allocation2] sm:$0xf]  ;;  %v1245_v48 = vshrl.u32 %v81_v46, 7  ;;  %vm667_vm2 = vcmask 257024  }
  0x2d   :  { %124 = vmatprep.subr.mxu0 %v76_v2  ;;  %v69_v7 = vld [vmem:[#allocation5 + $0x20] sm:$0xff]  ;;  %v67_v8 = vld [vmem:[#allocation5 + $0x8] sm:$0xff]  ;;  %417 = vperm.xlu0 %1020, %v62_v9   ;;  %v77_v12 = vld [vmem:[#allocation5 + $0x70] sm:$0xff]  ;;  %vm846_vm4 = vcmask 1043456   ;;  %s1167_s0 = smov [#allocation9]  }
  0x2e   :  { %125 = vmatpush1.msra.mxu0 %v75_v3  ;;  %v66_v10 = vld [vmem:[#allocation5] sm:$0xff]  ;;  %v74_v13 = vld [vmem:[#allocation5 + $0x50] sm:$0xff]  ;;  %v251_v17 = vld [vmem:[#allocation5 + $0x168] sm:$0xff]  ;;  %v1248_v50 = vsub.s32 0, %v1245_v48  ;;  %v1252_v57 = vsub.s32 1, %v1245_v48  ;;  %s876_s13 = sshll.u32 %s1167_s0, 4  ;;  %s877_s13 = int_to_ptr.vmem [resolvable:$true] %s876_s13 }
  0x2f   :  { %126 = vmatprep.subr.mxu0 %v73_v4  ;;  %v71_v14 = vld [vmem:[#allocation5 + $0x30] sm:$0xff]  ;;  %v250_v18 = vld [vmem:[#allocation5 + $0x160] sm:$0xff]  ;;  %v248_v19 = vld [vmem:[#allocation5 + $0x148] sm:$0xff]  ;;  %s1106_s14 = scalar_lea.vmem %s877_s13, 128  ;;  %p1111_p2 = scmp.lt.s32.totalorder %s877_s13, %s877_s13 }
  0x30   :  { %127 = vmatpush1.msra.mxu0 %v72_v5  ;;  %v68_v16 = vld [vmem:[#allocation5 + $0x10] sm:$0xff]  ;;  %v247_v21 = vld [vmem:[#allocation5 + $0x140] sm:$0xff]  ;;  %v245_v22 = vld [vmem:[#allocation5 + $0x128] sm:$0xff]  ;;  %p1107_p1 = scmp.ne.s32.totalorder %s877_s13, %s1106_s14  ;;  %p1112_p3 = scmp.lt.s32.totalorder %s1106_s14, %s1106_s14 }
  0x31   :  { %128 = vmatprep.subr.mxu0 %v70_v6  ;;  %1021 = vset.pattern.permute.xlu0 %v1166_v15  ;;  %v252_v20 = vld [vmem:[#allocation5 + $0x170] sm:$0xff]  ;;  %v244_v24 = vld [vmem:[#allocation5 + $0x120] sm:$0xff]  ;;  %v242_v26 = vld [vmem:[#allocation5 + $0x108] sm:$0xff]  ;;  %v1256_v15 = vsub.s32 2, %v1245_v48 }
  0x32   :  { %129 = vmatpush1.msra.mxu0 %v69_v7  ;;  %421 = vperm.xlu0 %1021, %v62_v9   ;;  %v249_v23 = vld [vmem:[#allocation5 + $0x150] sm:$0xff]  ;;  %v241_v27 = vld [vmem:[#allocation5 + $0x100] sm:$0xff]  ;;  %v1233_v29 = vld [vmem:[#allocation2 + $0x4] sm:$0xf]  ;;  %p1113_p4 = por %p1112_p3, %p1111_p2 }
  0x33   :  { %130 = vmatprep.subr.mxu0 %v67_v8  ;;  %949 = vmatpush3.msra.mxu1 %v252_v20  ;;  %v246_v25 = vld [vmem:[#allocation5 + $0x130] sm:$0xff]  ;;  %v475_v30 = vld [vmem:[#allocation5 + $0xe8] sm:$0xff]  ;;  %v477_v31 = vld [vmem:[#allocation5 + $0xf8] sm:$0xff] }
  0x34   :  { %131 = vmatpush1.msra.mxu0 %v66_v10  ;;  %950 = vmatprep.subr.mxu1 %v1163_v0  ;;  %v243_v28 = vld [vmem:[#allocation5 + $0x110] sm:$0xff]  ;;  %v474_v32 = vld [vmem:[#allocation5 + $0xe0] sm:$0xff]  ;;  %v471_v34 = vld [vmem:[#allocation5 + $0xc8] sm:$0xff]  ;;  %p1114_p5 = pnand %p1113_p4, %p1107_p1 }
  0x35   :  { %893 = vmatmul.mubr.msk.f32.vlgmr.msra.gmra.mxu0 %vm96_vm1, %v1218_v11  ;;  %937 = vmatprep.subr.mxu0 %v1163_v0  ;;  %v476_v33 = vld [vmem:[#allocation5 + $0xf0] sm:$0xff]  ;;  %v473_v35 = vld [vmem:[#allocation5 + $0xd8] sm:$0xff]  ;;  %v470_v36 = vld [vmem:[#allocation5 + $0xc0] sm:$0xff] }
  0x36   :  { %938 = vmatpush3.msra.mxu0 %v77_v12  ;;  %945 = vmatprep.mubr.msk.f32.mxu0 %vm1165_vm0, %v1163_v0  ;;  %v472_v37 = vld [vmem:[#allocation5 + $0xd0] sm:$0xff]  ;;  %v467_v38 = vld [vmem:[#allocation5 + $0xa8] sm:$0xff]  ;;  %v469_v39 = vld [vmem:[#allocation5 + $0xb8] sm:$0xff] }
  0x37   :  { %939 = vmatprep.subr.mxu0 %v1163_v0  ;;  %951 = vmatpush3.msra.mxu1 %v249_v23  ;;  %v466_v40 = vld [vmem:[#allocation5 + $0xa0] sm:$0xff]  ;;  %v468_v41 = vld [vmem:[#allocation5 + $0xb0] sm:$0xff]  ;;  %v463_v42 = vld [vmem:[#allocation5 + $0x88] sm:$0xff] }
  0x38   :  { %940 = vmatpush3.msra.mxu0 %v74_v13  ;;  %952 = vmatprep.subr.mxu1 %v1163_v0  ;;  %v465_v43 = vld [vmem:[#allocation5 + $0x98] sm:$0xff]  ;;  %v462_v44 = vld [vmem:[#allocation5 + $0x80] sm:$0xff]  ;;  %v464_v45 = vld [vmem:[#allocation5 + $0x90] sm:$0xff] }
  0x39   :  { %941 = vmatprep.subr.mxu0 %v1163_v0  ;;  %953 = vmatpush3.msra.mxu1 %v246_v25  ;;  %v424_v49 = vld [vmem:[#allocation5 + $0x200] ss:$0 sm:$0xff]  ;;  %v426_v51 = vld [vmem:[#allocation5 + $0x201] ss:$0 sm:$0xff]  ;;  %v436_v58 = vld [vmem:[#allocation5 + $0x202] ss:$0 sm:$0xff] }
  0x3a   :  { %942 = vmatpush3.msra.mxu0 %v71_v14  ;;  %954 = vmatprep.subr.mxu1 %v1163_v0  ;;  %v79_v53 = vld [vmem:[#allocation5 + $0x207] ss:$8 sm:$0x7]  ;;  %v438_v59 = vld [vmem:[#allocation5 + $0x203] ss:$0 sm:$0xff] }
  0x3b   :  { %943 = vmatprep.subr.mxu0 %v1163_v0  ;;  %955 = vmatpush3.msra.mxu1 %v243_v28  ;;  %v84_v56 = vrot.slane %v79_v53, %v1248_v50  ;;  %v88_v63 = vrot.slane %v79_v53, %v1252_v57  ;;  %v92_v20 = vrot.slane %v79_v53, %v1256_v15  ;;  %v453_v25 = vld [vmem:[#allocation5 + $0x206] ss:$0 sm:$0xff]  ;;  %v758_v53 = vld [vmem:[#allocation7 + $0x38] sm:$0xff] }
  0x3c   :  { %944 = vmatpush3.msra.mxu0 %v68_v16  ;;  %599 = vmatprep.subr.mxu1 %v477_v31  ;;  %v448_v16 = vld [vmem:[#allocation5 + $0x204] ss:$0 sm:$0xff] }
  0x3d   :  { %946 = vmatmul.mubr.msk.f32.vlgmr.msra.gmra.mxu0 %vm96_vm1, %v1218_v11  ;;  %298 = vmatprep.subr.mxu0 %v251_v17  ;;  %v450_v17 = vld [vmem:[#allocation5 + $0x205] ss:$0 sm:$0xff] }
  0x3e   :  { %338 = vmatprep.mubr.f32.mxu0 %v1163_v0  ;;  %299 = vmatpush1.msra.mxu0 %v250_v18 }
  0x3f   :  { %300 = vmatprep.subr.mxu0 %v248_v19  ;;  %957 = vmatmul.mubr.msk.f32.vlgmr.msra.gmra.mxu1 %vm96_vm1, %v1233_v29 }
  0x40   :  { %301 = vmatpush1.msra.mxu0 %v247_v21  ;;  %600 = vmatpush1.msra.mxu1 %v476_v33 }
  0x41   :  { %302 = vmatprep.subr.mxu0 %v245_v22  ;;  %601 = vmatprep.subr.mxu1 %v473_v35 }
  0x42   :  { %303 = vmatpush1.msra.mxu0 %v244_v24  ;;  %602 = vmatpush1.msra.mxu1 %v472_v37 }
  0x43   :  { %304 = vmatprep.subr.mxu0 %v242_v26  ;;  %603 = vmatprep.subr.mxu1 %v469_v39  ;;  %v674_v39 = vld [vmem:[#allocation5 + $0x1e0] sm:$0xff] }
  0x44   :  { %305 = vmatpush1.msra.mxu0 %v241_v27  ;;  %604 = vmatpush1.msra.mxu1 %v468_v41  ;;  %v671_v41 = vld [vmem:[#allocation5 + $0x180] sm:$0xff] }
  0x45   :  { %895 = vmatmul.mubr.msk.f32.vlgmr.msra.gmra.mxu0 %vm96_vm1, %v1233_v29  ;;  %528 = vmatprep.subr.mxu0 %v475_v30 }
  0x46   :  { %529 = vmatpush1.msra.mxu0 %v474_v32  ;;  %605 = vmatprep.subr.mxu1 %v465_v43  ;;  %v765_v43 = vld [vmem:[#allocation7 + $0x70] sm:$0xff] }
  0x47   :  { %530 = vmatprep.subr.mxu0 %v471_v34  ;;  %568 = vmatprep.mubr.f32.mxu0 %v1163_v0 }
  0x48   :  { %531 = vmatpush1.msra.mxu0 %v470_v36  ;;  %606 = vmatpush1.msra.mxu1 %v464_v45  ;;  %v763_v45 = vld [vmem:[#allocation7 + $0x60] sm:$0xff] }
  0x49   :  { %532 = vmatprep.subr.mxu0 %v467_v38  ;;  %639 = vmatprep.mubr.f32.mxu1 %v1163_v0 }
  0x4a   :  { %533 = vmatpush1.msra.mxu0 %v466_v40  ;;  %970 = vmatprep.subr.mxu1 %v1163_v0  ;;  %v673_v40 = vld [vmem:[#allocation5 + $0x1c0] sm:$0xff] }
  0x4b   :  { %534 = vmatprep.subr.mxu0 %v463_v42  ;;  %v766_v42 = vld [vmem:[#allocation7 + $0x78] sm:$0xff] }
  0x4c   :  { %535 = vmatpush1.msra.mxu0 %v462_v44  ;;  %v764_v44 = vld [vmem:[#allocation7 + $0x68] sm:$0xff] }
  0x4d   :  { %959 = vmatprep.subr.mxu0 %v1163_v0 }
  0xa8   :  { %v418_v47 = vpop.permute.xlu0 %417 }
  0xa9   :  { %v425_v54 = vmul.f32 %v424_v49, %v418_v47  ;;  %v437_v2 = vmul.f32 %v436_v58, %v418_v47  ;;  %v449_v18 = vmul.f32 %v448_v16, %v418_v47  ;;  %v762_v47 = vld [vmem:[#allocation7 + $0x58] sm:$0xff]  ;;  %v761_v49 = vld [vmem:[#allocation7 + $0x50] sm:$0xff] }
  0xaa   :  { %v254_v58 = vld [vmem:[#allocation5 + $0x221] ss:$8 sm:$0x7] }
  0xad   :  { %v422_v52 = vpop.permute.xlu0 %421 }
  0xae   :  { %v427_v55 = vmul.f32 %v426_v51, %v422_v52  ;;  %v439_v3 = vmul.f32 %v438_v59, %v422_v52  ;;  %v451_v19 = vmul.f32 %v450_v17, %v422_v52  ;;  %v760_v51 = vld [vmem:[#allocation7 + $0x48] sm:$0xff]  ;;  %v759_v52 = vld [vmem:[#allocation7 + $0x40] sm:$0xff]  ;;  %v267_v17 = vrot.slane %v254_v58, %v1256_v15 }
  0xb0   :  { %v428_v61 = vadd.f32 %v427_v55, %v425_v54  ;;  %v440_v7 = vadd.f32 %v439_v3, %v437_v2  ;;  %v452_v22 = vadd.f32 %v451_v19, %v449_v18  ;;  %v757_v54 = vld [vmem:[#allocation7 + $0x30] sm:$0xff]  ;;  %v756_v55 = vld [vmem:[#allocation7 + $0x28] sm:$0xff] }
  0xb2   :  { %v454_v27 = vadd.f32 %v453_v25, %v452_v22 }
  0xf5   :  { %v166_v60 = vpop.f32.mrf.mxu0 }
  0xf6   :  { %v167_v62 = vadd.f32 %v166_v60, %v84_v56  ;;  %v755_v56 = vld [vmem:[#allocation7 + $0x20] sm:$0xff] }
  0xf7   :  { %v168_v1 = vpop.f32.mrf.mxu0  ;;  %v479_v60 = vld [vmem:[#allocation5 + $0x220] ss:$8 sm:$0xf] }
  0xf8   :  { %v429_v4 = vadd.f32 %v428_v61, %v167_v62  ;;  %v169_v6 = vadd.f32 %v168_v1, %v88_v63  ;;  %v259_v61 = vrot.slane %v254_v58, %v1248_v50  ;;  %v484_v62 = vrot.slane %v479_v60, %v1248_v50 }
  0xf9   :  { %v492_v18 = vrot.slane %v479_v60, %v1256_v15  ;;  %v754_v15 = vld [vmem:[#allocation7 + $0x18] sm:$0xff] }
  0xfa   :  { %v897_v5 = vmul.f32 -1.442695, %v429_v4  ;;  %v441_v9 = vadd.f32 %v440_v7, %v169_v6  ;;  %v488_v4 = vrot.slane %v479_v60, %v1252_v57  ;;  %v263_v6 = vrot.slane %v254_v58, %v1252_v57 }
  0xfc   :  { %1022 = vpow2.f32 %v897_v5  ;;  %v898_v12 = vmul.f32 -1.442695, %v441_v9 }
  0xfd   :  { %v237_v8 = vpop.f32.mrf.mxu0 }
  0xfe   :  { %1024 = vpow2.f32 %v898_v12  ;;  %v238_v24 = vadd.f32 %v237_v8, %v92_v20 }
  0xff   :  { %v947_v10 = vpop.f32.mrf.mxu0  ;;  %v1267_v37 = vpop.f32.mrf.mxu1 }
 0x100   :  { %v412_v57 = vadd.f32 %v1267_v37, %v267_v17  ;;  %v675_v37 = vld [vmem:[#allocation5 + $0x222] ss:$0 sm:$0xff] }
 0x101   :  { %v958_v38 = vpop.f32.mrf.mxu1 }
 0x105   :  { %v340_v59 = vpop.f32.mrf.mxu0 }
 0x106   :  { %v341_v2 = vadd.f32 %v340_v59, %v259_v61 }
 0x107   :  { %v342_v63 = vpop.f32.mrf.mxu0 }
 0x108   :  { %v343_v10 = vadd.f32 %v342_v63, %v263_v6 }
 0x109   :  { %v1023_v13 = vpop.eup %1022 }
 0x10a   :  { %v433_v14 = vadd.f32 1.0, %v1023_v13 }
 0x10b   :  { %v1025_v21 = vpop.eup %1024 }
 0x10c   :  { %1026 = vrcp.f32 %v433_v14  ;;  %v445_v23 = vadd.f32 1.0, %v1025_v21 }
 0x10e   :  { %1028 = vrcp.f32 %v445_v23 }
 0x119   :  { %v1027_v26 = vpop.eup %1026 }
 0x11a   :  { %v455_v28 = vmul.f32 %v1027_v26, %v238_v24 }
 0x11b   :  { %v1029_v31 = vpop.eup %1028 }
 0x11c   :  { %v456_v30 = vadd.f32 %v455_v28, %v454_v27  ;;  %v458_v32 = vsub.f32 1.0, %v1029_v31  ;;  %v460_v35 = vmul.f32 %v1029_v31, %v1218_v11  ;;  %v672_v11 = vld [vmem:[#allocation5 + $0x1a0] sm:$0xff] }
 0x11e   :  { %1030 = vtanh.f32 %v456_v30 }
 0x12b   :  { %v1031_v33 = vpop.eup %1030 }
 0x12c   :  { %v459_v34 = vmul.f32 %v1031_v33, %v458_v32  ;;  %v753_v32 = vld [vmem:[#allocation7 + $0x10] sm:$0xff]  ;;  %v752_v33 = vld [vmem:[#allocation7 + $0x8] sm:$0xff] }
 0x12e   :  { %v461_v36 = vadd.f32 %v460_v35, %v459_v34  ;;  %v751_v34 = vld [vmem:[#allocation7] sm:$0xff] }
 0x130   :  { %899 = vmatmul.mubr.msk.f32.vlgmr.msra.gmra.mxu0 %vm96_vm1, %v461_v36  ;;  %900 = vmatmul.mubr.msk.f32.vlgmr.msra.gmra.mxu1 %vm96_vm1, %v461_v36  ;;  %668 = vst.msk [vmem:[#allocation9] sm:$0xf] %vm667_vm2, %v461_v36 }
 0x131   :  { %967 = vmatprep.mubr.msk.f32.mxu0 %vm1165_vm0, %v1163_v0  ;;  %1002 = vmatprep.mubr.msk.f32.mxu1 %vm1165_vm0, %v1163_v0 }
 0x132   :  { %960 = vmatpush3.msra.mxu0 %v674_v39  ;;  %971 = vmatpush3.msra.mxu1 %v766_v42 }
 0x133   :  { %961 = vmatprep.subr.mxu0 %v1163_v0  ;;  %972 = vmatprep.subr.mxu1 %v1163_v0 }
 0x134   :  { %962 = vmatpush3.msra.mxu0 %v673_v40  ;;  %973 = vmatpush3.msra.mxu1 %v765_v43  ;;  %v843_v43 = vand.u32 127, %v81_v46 }
 0x135   :  { %963 = vmatprep.subr.mxu0 %v1163_v0  ;;  %974 = vmatprep.subr.mxu1 %v1163_v0 }
 0x136   :  { %964 = vmatpush3.msra.mxu0 %v672_v11  ;;  %975 = vmatpush3.msra.mxu1 %v764_v44  ;;  %v904_v44 = vld [vmem:[#allocation7 + $0x80] ss:$0 sm:$0xff]  ;;  %vm844_vm3 = vcmp.lt.s32.totalorder %v843_v43, 3 }
 0x137   :  { %965 = vmatprep.subr.mxu0 %v1163_v0  ;;  %976 = vmatprep.subr.mxu1 %v1163_v0 }
 0x138   :  { %966 = vmatpush3.msra.mxu0 %v671_v41  ;;  %977 = vmatpush3.msra.mxu1 %v763_v45 }
 0x139   :  { %978 = vmatprep.subr.mxu1 %v1163_v0 }
 0x13a   :  { %979 = vmatpush3.msra.mxu1 %v762_v47 }
 0x13b   :  { %980 = vmatprep.subr.mxu1 %v1163_v0 }
 0x13c   :  { %981 = vmatpush3.msra.mxu1 %v761_v49 }
 0x13d   :  { %982 = vmatprep.subr.mxu1 %v1163_v0 }
 0x13e   :  { %983 = vmatpush3.msra.mxu1 %v760_v51 }
 0x13f   :  { %984 = vmatprep.subr.mxu1 %v1163_v0 }
 0x140   :  { %985 = vmatpush3.msra.mxu1 %v759_v52 }
 0x141   :  { %986 = vmatprep.subr.mxu1 %v1163_v0 }
 0x142   :  { %987 = vmatpush3.msra.mxu1 %v758_v53 }
 0x143   :  { %988 = vmatprep.subr.mxu1 %v1163_v0 }
 0x144   :  { %989 = vmatpush3.msra.mxu1 %v757_v54 }
 0x145   :  { %990 = vmatprep.subr.mxu1 %v1163_v0 }
 0x146   :  { %991 = vmatpush3.msra.mxu1 %v756_v55 }
 0x147   :  { %992 = vmatprep.subr.mxu1 %v1163_v0 }
 0x148   :  { %993 = vmatpush3.msra.mxu1 %v755_v56 }
 0x149   :  { %994 = vmatprep.subr.mxu1 %v1163_v0 }
 0x14a   :  { %995 = vmatpush3.msra.mxu1 %v754_v15 }
 0x14b   :  { %996 = vmatprep.subr.mxu1 %v1163_v0 }
 0x14c   :  { %997 = vmatpush3.msra.mxu1 %v753_v32 }
 0x14d   :  { %998 = vmatprep.subr.mxu1 %v1163_v0 }
 0x14e   :  { %999 = vmatpush3.msra.mxu1 %v752_v33 }
 0x14f   :  { %1000 = vmatprep.subr.mxu1 %v1163_v0 }
 0x150   :  { %1001 = vmatpush3.msra.mxu1 %v751_v34 }
 0x1f0   :  { %v570_v1 = vpop.f32.mrf.mxu0  ;;  %v641_v20 = vpop.f32.mrf.mxu1 }
 0x1f1   :  { %v571_v3 = vadd.f32 %v570_v1, %v484_v62  ;;  %v642_v22 = vadd.f32 %v641_v20, %v492_v18 }
 0x1f2   :  { %v572_v5 = vpop.f32.mrf.mxu0  ;;  %v643_v36 = vpop.f32.mrf.mxu1 }
 0x1f3   :  { %v646_v7 = vadd.f32 %v571_v3, %v341_v2  ;;  %v573_v9 = vadd.f32 %v572_v5, %v488_v4 }
 0x1f5   :  { %v901_v8 = vmul.f32 -1.442695, %v646_v7  ;;  %v653_v12 = vadd.f32 %v573_v9, %v343_v10 }
 0x1f7   :  { %1032 = vpow2.f32 %v901_v8  ;;  %v902_v13 = vmul.f32 -1.442695, %v653_v12 }
 0x1f9   :  { %1034 = vpow2.f32 %v902_v13 }
 0x204   :  { %v1033_v14 = vpop.eup %1032 }
 0x205   :  { %v650_v16 = vadd.f32 1.0, %v1033_v14 }
 0x206   :  { %v1035_v50 = vpop.eup %1034 }
 0x207   :  { %1036 = vrcp.f32 %v650_v16  ;;  %v657_v19 = vadd.f32 1.0, %v1035_v50 }
 0x209   :  { %1038 = vrcp.f32 %v657_v19 }
 0x214   :  { %v1037_v21 = vpop.eup %1036 }
 0x215   :  { %v660_v23 = vmul.f32 %v1037_v21, %v412_v57 }
 0x216   :  { %v1039_v25 = vpop.eup %1038 }
 0x217   :  { %v661_v24 = vadd.f32 %v660_v23, %v642_v22  ;;  %v663_v26 = vsub.f32 1.0, %v1039_v25  ;;  %v665_v30 = vmul.f32 %v1039_v25, %v1233_v29  ;;  %v495_v29 = vsub.s32 3, %v1245_v48 }
 0x219   :  { %1040 = vtanh.f32 %v661_v24  ;;  %v496_v35 = vrot.slane %v479_v60, %v495_v29 }
 0x21b   :  { %v644_v39 = vadd.f32 %v643_v36, %v496_v35 }
 0x226   :  { %v1041_v27 = vpop.eup %1040 }
 0x227   :  { %v664_v28 = vmul.f32 %v1041_v27, %v663_v26 }
 0x229   :  { %v666_v31 = vadd.f32 %v665_v30, %v664_v28 }
 0x22b   :  { %968 = vmatmul.mubr.msk.f32.vlgmr.msra.gmra.mxu0 %vm96_vm1, %v666_v31  ;;  %670 = vst.msk [vmem:[#allocation9 + $0x4] sm:$0xf] %vm667_vm2, %v666_v31 }
 0x2eb   :  { %v745_v38 = vpop.f32.mrf.mxu0 }
 0x2ec   :  { %v746_v40 = vadd.f32 %v745_v38, %v675_v37 }
 0x2ed   :  { %v969_v11 = vpop.f32.mrf.mxu0 }
 0x2ee   :  { %v749_v41 = vadd.f32 %v746_v40, %v644_v39 }
 0x2f0   :  { %v750_v42 = vmax.f32 %v749_v41, 0.0 }
 0x2f2   :  { %1003 = vmatmul.mubr.f32.vlgmr.msra.gmra.mxu1 %v750_v42 }
 0x3b2   :  { %v838_v45 = vpop.f32.mrf.mxu1 }
 0x3b3   :  { %v839_v0 = vadd.f32 %v904_v44, %v838_v45 }
 0x3b4   :  { %v1004_v47 = vpop.f32.mrf.mxu1 }
 0x3b5   :  { %v845_v48 = vsel %vm844_vm3, %v839_v0, -inf }
 0x3b6   :  { %v847_v49 = vsel %vm846_vm4, %v845_v48, -inf }
 0x3b7   :  { %848 = vmax.xlane.f32.xlu1 %v847_v49 }
 0x440   :  { %v849_v51 = vpop.xlane.xlu1 %848 }
 0x441   :  { %v850_v52 = vsub.f32 %v839_v0, %v849_v51 }
 0x443   :  { %v851_v53 = vmul.f32 1.442695, %v850_v52 }
 0x445   :  { %1042 = vpow2.f32 %v851_v53 }
 0x452   :  { %v1043_v54 = vpop.eup %1042 }
 0x453   :  { %v853_v55 = vsel %vm844_vm3, %v1043_v54, 0.0 }
 0x454   :  { %v854_v56 = vsel %vm846_vm4, %v853_v55, 0.0 }
 0x455   :  { %855 = vadd.xlane.f32.xlu1 %v854_v56 }
 0x456   :  { %1117 = shalt.err (!%p1114_p5)
}
 0x457   :  { %882 = dma.vmem_to_hbm [thread:$0]  %s877_s13, 128, %s1316_s5, [#allocation10], %s1158_s28, %s1158_s28, %s1159_s29  }
 0x458   :  { %s1168_s17 = smov [#allocation8]  }
 0x459   :  { %s867_s18 = sshll.u32 %s1168_s17, 4  ;;  %s868_s18 = int_to_ptr.vmem [resolvable:$true] %s867_s18 }
 0x45a   :  { %s1126_s19 = scalar_lea.vmem %s868_s18, 64  ;;  %p1131_p7 = scmp.lt.s32.totalorder %s868_s18, %s868_s18 }
 0x45b   :  { %p1127_p6 = scmp.ne.s32.totalorder %s868_s18, %s1126_s19  ;;  %p1132_p8 = scmp.lt.s32.totalorder %s1126_s19, %s1126_s19 }
 0x45d   :  { %p1133_p9 = por %p1132_p8, %p1131_p7 }
 0x45f   :  { %p1134_p10 = pnand %p1133_p9, %p1127_p6 }
 0x4de   :  { %v856_v46 = vpop.xlane.xlu1 %855 }
 0x4df   :  { %1044 = vrcp.f32 %v856_v46 }
 0x4ec   :  { %v1045_v58 = vpop.eup %1044 }
 0x4ed   :  { %v858_v59 = vmul.f32 %v1045_v58, %v1043_v54 }
 0x4ef   :  { %v859_v60 = vsel %vm844_vm3, %v858_v59, %v839_v0 }
 0x4f0   :  { %860 = vst [vmem:[#allocation8] sm:$0xf] %v859_v60 }
 0x4f1   :  { %1137 = shalt.err (!%p1134_p10)
}
 0x4f2   :  { %870 = dma.vmem_to_hbm [thread:$0]  %s868_s18, 64, %s1315_s4, [#allocation4]  }
 0x4f3   :  { %1150 = dma.done.wait [#allocation4], 64  }
 0x4f4   :  { %1151 = vsyncadd [#allocation4], 4294967232 }
 0x4f5   :  { %1152 = dma.done.wait [#allocation10], 128  }
 0x4f6   :  { %1153 = vsyncadd [#allocation10], 4294967168 }
 0x4f7   :  { %889 = vsyncpa [#allocation3], 1 }
 0x4f8   :  { %890 = vsyncpa [#allocation6], 1 }
 0x4f9   :  { %891 = vsyncpa [#allocation4], 1 }
 0x4fa   :  { %892 = vsyncpa [#allocation10], 1 }

</bundles_post_ra>
